<compile_context>
chip_gen: v7x
topology: tpu7x:2x2x1
jax: 0.10.0
libtpu: 0.0.40
codegen_flags: <defaults>
</compile_context>

<pallas_src>
import functools

import jax
import jax.numpy as jnp
from jax.experimental import pallas as pl
from jax.experimental.pallas import tpu as pltpu


# Batch rows per grid step. 256 keeps (2x double-buffered input tile + output
# tile + resident padded weights + f32 intermediates) well under the 32 MiB
# default scoped VMEM even on v7x (64 MiB physical). On v5e/v6e (128 MiB VMEM)
# this can be swept up to 1024-2048 for large batches.
_TILE_B = 256
_EPS = 0.05


def _round_up(x, m):
    return ((x + m - 1) // m) * m


def _policy_kernel(x_ref, w1_ref, b1_ref, w2_ref, b2_ref, w3_ref, b3_ref,
                   wa_ref, ba_ref, out_ref, *, action_size):
    # Activations/weights are bf16; all matmul accumulation is f32 on the MXU.
    x = x_ref[...]

    # Linear 1 + ReLU   (S -> 2S)
    h = jnp.dot(x, w1_ref[...], preferred_element_type=jnp.float32) + b1_ref[...]
    h = jnp.maximum(h, 0.0).astype(jnp.bfloat16)

    # Linear 2 + ReLU   (2S -> 2S)
    h = jnp.dot(h, w2_ref[...], preferred_element_type=jnp.float32) + b2_ref[...]
    h = jnp.maximum(h, 0.0).astype(jnp.bfloat16)

    # Linear 3          (2S -> S)
    s = jnp.dot(h, w3_ref[...], preferred_element_type=jnp.float32) + b3_ref[...]
    s = s.astype(jnp.bfloat16)

    # Action head       (S -> A_pad)
    logits = jnp.dot(s, wa_ref[...], preferred_element_type=jnp.float32) + ba_ref[...]

    # Mask zero-padded action lanes so they don't contribute to the softmax.
    a_pad = logits.shape[-1]
    if action_size < a_pad:
        lane = jax.lax.broadcasted_iota(jnp.int32, logits.shape, dimension=1)
        logits = jnp.where(lane < action_size, logits, jnp.float32(-1e30))

    # Numerically-stable softmax (f32); divide via the EUP approx reciprocal.
    m = jnp.max(logits, axis=-1, keepdims=True)
    e = jnp.exp(logits - m)
    denom = jnp.sum(e, axis=-1, keepdims=True)
    probs = e * pl.reciprocal(denom, approx=True)

    # (p + eps) / (1 + eps * A)  ==  p * c + eps * c, with trace-time constant c.
    c = 1.0 / (1.0 + _EPS * action_size)
    adjusted = probs * jnp.float32(c) + jnp.float32(_EPS * c)

    out_ref[...] = adjusted.astype(out_ref.dtype)


@functools.partial(jax.jit, static_argnames=("action_size",))
def policy_network_forward(state, params, action_size):
    """Fused PolicyNetwork forward pass on TPU via Pallas.

    state:  (batch, state_size) float32
    params: dict with w1,b1,w2,b2,w3,b3,wa,ba (weights as (in, out), biases (1, out))
    """
    batch, state_size = state.shape
    hidden = 2 * state_size

    # Lane-dense (multiple-of-128) padded feature dims.
    s_pad = _round_up(state_size, 128)
    h_pad = _round_up(hidden, 128)
    a_pad = _round_up(action_size, 128)

    # Batch tiling (sublane multiple of 8).
    tile_b = min(_TILE_B, _round_up(batch, 8))
    b_pad = _round_up(batch, tile_b)
    grid = (b_pad // tile_b,)

    # Zero-pad inputs / params (layout plumbing, not compute). In a real
    # pipeline the padded bf16 params would be materialized once, not per call.
    def pad_w(w, r, c):
        return jnp.zeros((r, c), jnp.bfloat16).at[:w.shape[0], :w.shape[1]].set(
            w.astype(jnp.bfloat16))

    def pad_b(b, c):
        return jnp.zeros((1, c), jnp.float32).at[:, :b.shape[1]].set(
            b.astype(jnp.float32))

    x = jnp.zeros((b_pad, s_pad), jnp.bfloat16).at[:batch, :state_size].set(
        state.astype(jnp.bfloat16))
    w1 = pad_w(params["w1"], s_pad, h_pad); b1 = pad_b(params["b1"], h_pad)
    w2 = pad_w(params["w2"], h_pad, h_pad); b2 = pad_b(params["b2"], h_pad)
    w3 = pad_w(params["w3"], h_pad, s_pad); b3 = pad_b(params["b3"], s_pad)
    wa = pad_w(params["wa"], s_pad, a_pad); ba = pad_b(params["ba"], a_pad)

    # Activation tiles stream along the batch grid; weights stay resident
    # (constant block index across all grid steps -> fetched once).
    x_spec = pl.BlockSpec((tile_b, s_pad), lambda i: (i, 0))
    out_spec = pl.BlockSpec((tile_b, a_pad), lambda i: (i, 0))

    def resident(shape):
        return pl.BlockSpec(shape, lambda i: (0, 0))

    in_specs = [
        x_spec,
        resident((s_pad, h_pad)), resident((1, h_pad)),
        resident((h_pad, h_pad)), resident((1, h_pad)),
        resident((h_pad, s_pad)), resident((1, s_pad)),
        resident((s_pad, a_pad)), resident((1, a_pad)),
    ]

    flops = 2 * b_pad * (s_pad * h_pad + h_pad * h_pad + h_pad * s_pad
                         + s_pad * a_pad)
    bytes_accessed = (
        x.size * 2 + b_pad * a_pad * 4                      # activations in/out
        + (w1.size + w2.size + w3.size + wa.size) * 2       # bf16 weights
        + (b1.size + b2.size + b3.size + ba.size) * 4)      # f32 biases
    cost = pl.CostEstimate(flops=flops,
                           transcendentals=b_pad * a_pad,   # exp
                           bytes_accessed=bytes_accessed)

    out_padded = pl.pallas_call(
        functools.partial(_policy_kernel, action_size=action_size),
        out_shape=jax.ShapeDtypeStruct((b_pad, a_pad), jnp.float32),
        grid=grid,
        in_specs=in_specs,
        out_specs=out_spec,
        compiler_params=pltpu.CompilerParams(
            dimension_semantics=("parallel",),
            vmem_limit_bytes=32 * 1024 * 1024,
        ),
        cost_estimate=cost,
    )(x, w1, b1, w2, b2, w3, b3, wa, ba)

    return out_padded[:batch, :action_size]


def init_params(key, state_size, action_size):
    """Deterministic synthetic init (uniform, roughly PyTorch-Linear-like scale)."""
    dims = [
        ("w1", (state_size, 2 * state_size)), ("b1", (1, 2 * state_size)),
        ("w2", (2 * state_size, 2 * state_size)), ("b2", (1, 2 * state_size)),
        ("w3", (2 * state_size, state_size)), ("b3", (1, state_size)),
        ("wa", (state_size, action_size)), ("ba", (1, action_size)),
    ]
    params = {}
    keys = jax.random.split(key, len(dims))
    for k, (name, shape) in zip(keys, dims):
        fan_in = shape[0] if name.startswith("w") else shape[1]
        bound = 1.0 / jnp.sqrt(jnp.float32(fan_in))
        params[name] = jax.random.uniform(
            k, shape, dtype=jnp.float32, minval=-bound, maxval=bound)
    return params


def _reference_forward(state, params, action_size):
    """Pure-JAX f32 reference for correctness checking."""
    h = jnp.maximum(state @ params["w1"] + params["b1"], 0.0)
    h = jnp.maximum(h @ params["w2"] + params["b2"], 0.0)
    s = h @ params["w3"] + params["b3"]
    logits = s @ params["wa"] + params["ba"]
    p = jax.nn.softmax(logits, axis=-1)
    eps = 0.05
    return (p + eps) / (1.0 + eps * action_size)


if __name__ == "__main__":
    batch, state_size, action_size = 8, 32, 8

    key = jax.random.PRNGKey(0)
    k_state, k_params = jax.random.split(key)

    state = jax.random.normal(k_state, (batch, state_size), dtype=jnp.float32)
    params = init_params(k_params, state_size, action_size)

    out = policy_network_forward(state, params, action_size)
    out = jax.block_until_ready(out)

    ref = _reference_forward(state, params, action_size)
    assert out.shape == (batch, action_size)
    # bf16 MXU operands + EUP approx reciprocal -> compare against the f32
    # reference with a correspondingly looser tolerance.
    assert jnp.allclose(out, ref, atol=2e-2, rtol=2e-2), "mismatch vs JAX reference"
    # Adjusted probs still sum to ~1 (approx reciprocal adds ~1e-3 rel error).
    assert jnp.allclose(jnp.sum(out, axis=-1), 1.0, atol=5e-3)

    print("KERNEL_OK")
</pallas_src>

<mosaic_0001>
module attributes {stable_mosaic.version = 11 : i64} {
  func.func @_policy_kernel(%arg0: i32, %arg1: memref<8x128xbf16, #tpu.memory_space<vmem>>, %arg2: memref<128x128xbf16, #tpu.memory_space<vmem>>, %arg3: memref<1x128xf32, #tpu.memory_space<vmem>>, %arg4: memref<128x128xbf16, #tpu.memory_space<vmem>>, %arg5: memref<1x128xf32, #tpu.memory_space<vmem>>, %arg6: memref<128x128xbf16, #tpu.memory_space<vmem>>, %arg7: memref<1x128xf32, #tpu.memory_space<vmem>>, %arg8: memref<128x128xbf16, #tpu.memory_space<vmem>>, %arg9: memref<1x128xf32, #tpu.memory_space<vmem>>, %arg10: memref<8x128xf32, #tpu.memory_space<vmem>>) attributes {dimension_semantics = [#tpu.dimension_semantics<parallel>], iteration_bounds = array<i64: 1>, scalar_prefetch = 0 : i64, scratch_operands = 0 : i64, tpu.core_type = #tpu.core_type<tc>, window_params = [{transform_indices = @transform_0, window_bounds = array<i64: 8, 128>}, {pipeline_mode = #tpu.pipeline_mode<synchronous>, transform_indices = @transform_1, window_bounds = array<i64: 128, 128>}, {pipeline_mode = #tpu.pipeline_mode<synchronous>, transform_indices = @transform_2, window_bounds = array<i64: 1, 128>}, {pipeline_mode = #tpu.pipeline_mode<synchronous>, transform_indices = @transform_3, window_bounds = array<i64: 128, 128>}, {pipeline_mode = #tpu.pipeline_mode<synchronous>, transform_indices = @transform_4, window_bounds = array<i64: 1, 128>}, {pipeline_mode = #tpu.pipeline_mode<synchronous>, transform_indices = @transform_5, window_bounds = array<i64: 128, 128>}, {pipeline_mode = #tpu.pipeline_mode<synchronous>, transform_indices = @transform_6, window_bounds = array<i64: 1, 128>}, {pipeline_mode = #tpu.pipeline_mode<synchronous>, transform_indices = @transform_7, window_bounds = array<i64: 128, 128>}, {pipeline_mode = #tpu.pipeline_mode<synchronous>, transform_indices = @transform_8, window_bounds = array<i64: 1, 128>}, {transform_indices = @transform_9, window_bounds = array<i64: 8, 128>}]} {
    %c0 = arith.constant 0 : index
    %c0_0 = arith.constant 0 : index
    %0 = vector.load %arg1[%c0, %c0_0] : memref<8x128xbf16, #tpu.memory_space<vmem>>, vector<8x128xbf16>
    %c0_1 = arith.constant 0 : index
    %c0_2 = arith.constant 0 : index
    %1 = vector.load %arg2[%c0_1, %c0_2] : memref<128x128xbf16, #tpu.memory_space<vmem>>, vector<128x128xbf16>
    %cst = arith.constant dense<0.000000e+00> : vector<8x128xf32>
    %2 = tpu.matmul %0, %1, %cst {dimension_numbers = #tpu.dot_dimension_numbers<[1], [0], [0], [1], [0, 0, 1, 1], [], []>} : vector<8x128xbf16>, vector<128x128xbf16>, vector<8x128xf32> -> vector<8x128xf32>
    %c0_3 = arith.constant 0 : index
    %c0_4 = arith.constant 0 : index
    %3 = vector.load %arg3[%c0_3, %c0_4] : memref<1x128xf32, #tpu.memory_space<vmem>>, vector<1x128xf32>
    %4 = vector.broadcast %3 : vector<1x128xf32> to vector<8x128xf32>
    %5 = arith.addf %2, %4 : vector<8x128xf32>
    %cst_5 = arith.constant 0.000000e+00 : f32
    %6 = vector.broadcast %cst_5 : f32 to vector<8x128xf32>
    %7 = arith.maximumf %5, %6 : vector<8x128xf32>
    %8 = arith.truncf %7 : vector<8x128xf32> to vector<8x128xbf16>
    %c0_6 = arith.constant 0 : index
    %c0_7 = arith.constant 0 : index
    %9 = vector.load %arg4[%c0_6, %c0_7] : memref<128x128xbf16, #tpu.memory_space<vmem>>, vector<128x128xbf16>
    %cst_8 = arith.constant dense<0.000000e+00> : vector<8x128xf32>
    %10 = tpu.matmul %8, %9, %cst_8 {dimension_numbers = #tpu.dot_dimension_numbers<[1], [0], [0], [1], [0, 0, 1, 1], [], []>} : vector<8x128xbf16>, vector<128x128xbf16>, vector<8x128xf32> -> vector<8x128xf32>
    %c0_9 = arith.constant 0 : index
    %c0_10 = arith.constant 0 : index
    %11 = vector.load %arg5[%c0_9, %c0_10] : memref<1x128xf32, #tpu.memory_space<vmem>>, vector<1x128xf32>
    %12 = vector.broadcast %11 : vector<1x128xf32> to vector<8x128xf32>
    %13 = arith.addf %10, %12 : vector<8x128xf32>
    %cst_11 = arith.constant 0.000000e+00 : f32
    %14 = vector.broadcast %cst_11 : f32 to vector<8x128xf32>
    %15 = arith.maximumf %13, %14 : vector<8x128xf32>
    %16 = arith.truncf %15 : vector<8x128xf32> to vector<8x128xbf16>
    %c0_12 = arith.constant 0 : index
    %c0_13 = arith.constant 0 : index
    %17 = vector.load %arg6[%c0_12, %c0_13] : memref<128x128xbf16, #tpu.memory_space<vmem>>, vector<128x128xbf16>
    %cst_14 = arith.constant dense<0.000000e+00> : vector<8x128xf32>
    %18 = tpu.matmul %16, %17, %cst_14 {dimension_numbers = #tpu.dot_dimension_numbers<[1], [0], [0], [1], [0, 0, 1, 1], [], []>} : vector<8x128xbf16>, vector<128x128xbf16>, vector<8x128xf32> -> vector<8x128xf32>
    %c0_15 = arith.constant 0 : index
    %c0_16 = arith.constant 0 : index
    %19 = vector.load %arg7[%c0_15, %c0_16] : memref<1x128xf32, #tpu.memory_space<vmem>>, vector<1x128xf32>
    %20 = vector.broadcast %19 : vector<1x128xf32> to vector<8x128xf32>
    %21 = arith.addf %18, %20 : vector<8x128xf32>
    %22 = arith.truncf %21 : vector<8x128xf32> to vector<8x128xbf16>
    %c0_17 = arith.constant 0 : index
    %c0_18 = arith.constant 0 : index
    %23 = vector.load %arg8[%c0_17, %c0_18] : memref<128x128xbf16, #tpu.memory_space<vmem>>, vector<128x128xbf16>
    %cst_19 = arith.constant dense<0.000000e+00> : vector<8x128xf32>
    %24 = tpu.matmul %22, %23, %cst_19 {dimension_numbers = #tpu.dot_dimension_numbers<[1], [0], [0], [1], [0, 0, 1, 1], [], []>} : vector<8x128xbf16>, vector<128x128xbf16>, vector<8x128xf32> -> vector<8x128xf32>
    %c0_20 = arith.constant 0 : index
    %c0_21 = arith.constant 0 : index
    %25 = vector.load %arg9[%c0_20, %c0_21] : memref<1x128xf32, #tpu.memory_space<vmem>>, vector<1x128xf32>
    %26 = vector.broadcast %25 : vector<1x128xf32> to vector<8x128xf32>
    %27 = arith.addf %24, %26 : vector<8x128xf32>
    %28 = tpu.iota {dimensions = array<i32: 1>} : vector<8x128xi32>
    %c8_i32 = arith.constant 8 : i32
    %29 = vector.broadcast %c8_i32 : i32 to vector<8x128xi32>
    %30 = arith.cmpi slt, %28, %29 : vector<8x128xi32>
    %cst_22 = arith.constant -1.000000e+30 : f32
    %31 = vector.broadcast %cst_22 : f32 to vector<8x128xf32>
    %32 = arith.select %30, %27, %31 : vector<8x128xi1>, vector<8x128xf32>
    %cst_23 = arith.constant dense<0xFF800000> : vector<8xf32>
    %33 = vector.multi_reduction <maximumf>, %32, %cst_23 [1] : vector<8x128xf32> to vector<8xf32>
    %34 = vector.shape_cast %33 : vector<8xf32> to vector<8x1xf32>
    %35 = vector.broadcast %34 : vector<8x1xf32> to vector<8x128xf32>
    %36 = arith.subf %32, %35 : vector<8x128xf32>
    %37 = math.exp %36 : vector<8x128xf32>
    %cst_24 = arith.constant dense<0.000000e+00> : vector<8xf32>
    %38 = vector.multi_reduction <add>, %37, %cst_24 [1] : vector<8x128xf32> to vector<8xf32>
    %39 = vector.shape_cast %38 : vector<8xf32> to vector<8x1xf32>
    %40 = tpu.reciprocal %39 {approx = true} : vector<8x1xf32> -> vector<8x1xf32>
    %41 = vector.broadcast %40 : vector<8x1xf32> to vector<8x128xf32>
    %42 = arith.mulf %37, %41 : vector<8x128xf32>
    %cst_25 = arith.constant 0.714285731 : f32
    %43 = vector.broadcast %cst_25 : f32 to vector<8x128xf32>
    %44 = arith.mulf %42, %43 : vector<8x128xf32>
    %cst_26 = arith.constant 0.0357142873 : f32
    %45 = vector.broadcast %cst_26 : f32 to vector<8x128xf32>
    %46 = arith.addf %44, %45 : vector<8x128xf32>
    %c0_27 = arith.constant 0 : index
    %c0_28 = arith.constant 0 : index
    %47 = vector.load %arg10[%c0_27, %c0_28] : memref<8x128xf32, #tpu.memory_space<vmem>>, vector<8x128xf32>
    tpu.vector_store %arg10[%c0_27, %c0_28], %46 {strides = array<i32>} : memref<8x128xf32, #tpu.memory_space<vmem>>, vector<8x128xf32>,
    return
  }
  func.func @transform_0(%arg0: i32) -> (i32, i32) {
    %c0_i32 = arith.constant 0 : i32
    %c0_i32_0 = arith.constant 0 : i32
    return %arg0, %c0_i32 : i32, i32
  }
  func.func @transform_1(%arg0: i32) -> (i32, i32) {
    %c0_i32 = arith.constant 0 : i32
    %c0_i32_0 = arith.constant 0 : i32
    %c0_i32_1 = arith.constant 0 : i32
    return %c0_i32, %c0_i32_0 : i32, i32
  }
  func.func @transform_2(%arg0: i32) -> (i32, i32) {
    %c0_i32 = arith.constant 0 : i32
    %c0_i32_0 = arith.constant 0 : i32
    %c0_i32_1 = arith.constant 0 : i32
    return %c0_i32, %c0_i32_0 : i32, i32
  }
  func.func @transform_3(%arg0: i32) -> (i32, i32) {
    %c0_i32 = arith.constant 0 : i32
    %c0_i32_0 = arith.constant 0 : i32
    %c0_i32_1 = arith.constant 0 : i32
    return %c0_i32, %c0_i32_0 : i32, i32
  }
  func.func @transform_4(%arg0: i32) -> (i32, i32) {
    %c0_i32 = arith.constant 0 : i32
    %c0_i32_0 = arith.constant 0 : i32
    %c0_i32_1 = arith.constant 0 : i32
    return %c0_i32, %c0_i32_0 : i32, i32
  }
  func.func @transform_5(%arg0: i32) -> (i32, i32) {
    %c0_i32 = arith.constant 0 : i32
    %c0_i32_0 = arith.constant 0 : i32
    %c0_i32_1 = arith.constant 0 : i32
    return %c0_i32, %c0_i32_0 : i32, i32
  }
  func.func @transform_6(%arg0: i32) -> (i32, i32) {
    %c0_i32 = arith.constant 0 : i32
    %c0_i32_0 = arith.constant 0 : i32
    %c0_i32_1 = arith.constant 0 : i32
    return %c0_i32, %c0_i32_0 : i32, i32
  }
  func.func @transform_7(%arg0: i32) -> (i32, i32) {
    %c0_i32 = arith.constant 0 : i32
    %c0_i32_0 = arith.constant 0 : i32
    %c0_i32_1 = arith.constant 0 : i32
    return %c0_i32, %c0_i32_0 : i32, i32
  }
  func.func @transform_8(%arg0: i32) -> (i32, i32) {
    %c0_i32 = arith.constant 0 : i32
    %c0_i32_0 = arith.constant 0 : i32
    %c0_i32_1 = arith.constant 0 : i32
    return %c0_i32, %c0_i32_0 : i32, i32
  }
  func.func @transform_9(%arg0: i32) -> (i32, i32) {
    %c0_i32 = arith.constant 0 : i32
    %c0_i32_0 = arith.constant 0 : i32
    return %arg0, %c0_i32 : i32, i32
  }
}

</mosaic_0001>

<bundles_post_ra>
// kernel: policy_network_forward.1
= control target key start
LH: loop header
LB: loop body
LE: loop exit
PB: predicated region body
PF: predicated region fallthrough
CT: control target
= control target key end

     0   :  { %v729_v1 = vmov 0.0   ;;  %vm730_vm0 = vmmov 0   ;;  %s945_s0 = inlined_call_operand.vmem [shape: bf16[8,128], index: 0, kind: input, shape index: {}]   ;;  %s946_s1 = inlined_call_operand.vmem [shape: bf16[128,128], index: 1, kind: input, shape index: {}]   ;;  %s947_s2 = inlined_call_operand.vmem [shape: f32[1,128], index: 2, kind: input, shape index: {}]   ;;  %s948_s3 = inlined_call_operand.vmem [shape: bf16[128,128], index: 3, kind: input, shape index: {}]   ;;  %s949_s4 = inlined_call_operand.vmem [shape: f32[1,128], index: 4, kind: input, shape index: {}]   ;;  %s950_s5 = inlined_call_operand.vmem [shape: bf16[128,128], index: 5, kind: input, shape index: {}]   ;;  %s951_s6 = inlined_call_operand.vmem [shape: f32[1,128], index: 6, kind: input, shape index: {}]   ;;  %s952_s7 = inlined_call_operand.vmem [shape: bf16[128,128], index: 7, kind: input, shape index: {}]   ;;  %s953_s8 = inlined_call_operand.vmem [shape: f32[1,128], index: 8, kind: input, shape index: {}]   ;;  %s954_s9 = inlined_call_operand.hbm [shape: f32[8,128], index: 9, kind: output, shape index: {}]  }
   0x1   :  { %v669_v0 = vld [vmem:[%s946_s1] sm:$0xff]   ;;  %586 = vmatprep.subr.bf16.mxu0 %v729_v1  ;;  %606 = vmatprep.subr.bf16.mxu1 %v729_v1  ;;  %v670_v2 = vld [vmem:[%s946_s1 + $0x8] sm:$0xff]   ;;  %v671_v3 = vld [vmem:[%s946_s1 + $0x10] sm:$0xff]  }
   0x2   :  { %587 = vmatpush3.bf16.msra.mxu0 %v669_v0  ;;  %602 = vmatprep.mubr.msk.bf16.mxu0 %vm730_vm0, %v729_v1  ;;  %v677_v4 = vld [vmem:[%s948_s3] sm:$0xff]   ;;  %v672_v5 = vld [vmem:[%s946_s1 + $0x18] sm:$0xff]   ;;  %v678_v6 = vld [vmem:[%s948_s3 + $0x8] sm:$0xff]  }
   0x3   :  { %588 = vmatprep.subr.bf16.mxu0 %v729_v1  ;;  %622 = vmatprep.mubr.msk.bf16.mxu1 %vm730_vm0, %v729_v1  ;;  %v673_v7 = vld [vmem:[%s946_s1 + $0x20] sm:$0xff]   ;;  %v679_v8 = vld [vmem:[%s948_s3 + $0x10] sm:$0xff]   ;;  %v674_v9 = vld [vmem:[%s946_s1 + $0x28] sm:$0xff]  }
   0x4   :  { %607 = vmatpush3.bf16.msra.mxu1 %v677_v4  ;;  %v680_v10 = vld [vmem:[%s948_s3 + $0x18] sm:$0xff]   ;;  %v675_v11 = vld [vmem:[%s946_s1 + $0x30] sm:$0xff]   ;;  %v681_v12 = vld [vmem:[%s948_s3 + $0x20] sm:$0xff]  }
   0x5   :  { %608 = vmatprep.subr.bf16.mxu1 %v729_v1  ;;  %v676_v13 = vld [vmem:[%s946_s1 + $0x38] sm:$0xff]  }
   0x6   :  { %589 = vmatpush3.bf16.msra.mxu0 %v670_v2 }
   0x7   :  { %590 = vmatprep.subr.bf16.mxu0 %v729_v1 }
   0x8   :  { %609 = vmatpush3.bf16.msra.mxu1 %v678_v6 }
   0x9   :  { %610 = vmatprep.subr.bf16.mxu1 %v729_v1 }
   0xa   :  { %591 = vmatpush3.bf16.msra.mxu0 %v671_v3 }
   0xb   :  { %592 = vmatprep.subr.bf16.mxu0 %v729_v1 }
   0xc   :  { %611 = vmatpush3.bf16.msra.mxu1 %v679_v8 }
   0xd   :  { %612 = vmatprep.subr.bf16.mxu1 %v729_v1 }
   0xe   :  { %593 = vmatpush3.bf16.msra.mxu0 %v672_v5 }
   0xf   :  { %594 = vmatprep.subr.bf16.mxu0 %v729_v1 }
  0x10   :  { %613 = vmatpush3.bf16.msra.mxu1 %v680_v10 }
  0x11   :  { %614 = vmatprep.subr.bf16.mxu1 %v729_v1 }
  0x12   :  { %595 = vmatpush3.bf16.msra.mxu0 %v673_v7 }
  0x13   :  { %596 = vmatprep.subr.bf16.mxu0 %v729_v1 }
  0x16   :  { %597 = vmatpush3.bf16.msra.mxu0 %v674_v9 }
  0x17   :  { %598 = vmatprep.subr.bf16.mxu0 %v729_v1 }
  0x1a   :  { %599 = vmatpush3.bf16.msra.mxu0 %v675_v11 }
  0x1b   :  { %14 = vsyncpa [#allocation3], 0  ;;  %600 = vmatprep.subr.bf16.mxu0 %v729_v1  ;;  %615 = vmatpush3.bf16.msra.mxu1 %v681_v12  ;;  %v682_v14 = vld [vmem:[%s948_s3 + $0x28] sm:$0xff]   ;;  %v34_v15 = vld [vmem:[%s945_s0] sm:$0xf]  ;;  %v484_v57 = vlaneseq }
  0x1c   :  { %616 = vmatprep.subr.bf16.mxu1 %v729_v1  ;;  %v683_v16 = vld [vmem:[%s948_s3 + $0x30] sm:$0xff]   ;;  %v684_v17 = vld [vmem:[%s948_s3 + $0x38] sm:$0xff]   ;;  %v685_v18 = vld [vmem:[%s950_s5] sm:$0xff]  }
  0x1d   :  { %v686_v19 = vld [vmem:[%s950_s5 + $0x8] sm:$0xff]   ;;  %v687_v20 = vld [vmem:[%s950_s5 + $0x10] sm:$0xff]   ;;  %v688_v21 = vld [vmem:[%s950_s5 + $0x18] sm:$0xff]   ;;  %v485_v58 = vand.u32 127, %v484_v57 }
  0x1e   :  { %601 = vmatpush3.bf16.msra.mxu0 %v676_v13  ;;  %v689_v22 = vld [vmem:[%s950_s5 + $0x20] sm:$0xff]   ;;  %v690_v23 = vld [vmem:[%s950_s5 + $0x28] sm:$0xff]   ;;  %v691_v32 = vld [vmem:[%s950_s5 + $0x30] sm:$0xff]  }
  0x1f   :  { %617 = vmatpush3.bf16.msra.mxu1 %v682_v14  ;;  %626 = vmatprep.subr.bf16.mxu0 %v729_v1  ;;  %v514_v24 = vld [vmem:[%s947_s2] ss:$0 sm:$0xff]  ;;  %v692_v33 = vld [vmem:[%s950_s5 + $0x38] sm:$0xff]   ;;  %v694_v35 = vld [vmem:[%s952_s7 + $0x8] sm:$0xff]   ;;  %vm486_vm1 = vcmp.lt.s32.totalorder %v485_v58, 8 }
  0x20   :  { %618 = vmatprep.subr.bf16.mxu1 %v729_v1  ;;  %v693_v34 = vld [vmem:[%s952_s7] sm:$0xff]   ;;  %v695_v36 = vld [vmem:[%s952_s7 + $0x10] sm:$0xff]   ;;  %v696_v37 = vld [vmem:[%s952_s7 + $0x18] sm:$0xff]  }
  0x21   :  { %603 = vmatmul.mubr.bf16.vlgmr.msra.gmra.mrb[0].mxu0 %v34_v15  ;;  %v697_v38 = vld [vmem:[%s952_s7 + $0x20] sm:$0xff]   ;;  %v698_v39 = vld [vmem:[%s952_s7 + $0x28] sm:$0xff]   ;;  %v699_v40 = vld [vmem:[%s952_s7 + $0x30] sm:$0xff]  }
  0x22   :  { %642 = vmatprep.mubr.msk.bf16.mxu0 %vm730_vm0, %v729_v1  ;;  %627 = vmatpush3.bf16.msra.mxu0 %v685_v18  ;;  %v523_v41 = vld [vmem:[%s949_s4] ss:$0 sm:$0xff]  ;;  %v700_v49 = vld [vmem:[%s952_s7 + $0x38] sm:$0xff]  }
  0x23   :  { %619 = vmatpush3.bf16.msra.mxu1 %v683_v16  ;;  %628 = vmatprep.subr.bf16.mxu0 %v729_v1  ;;  %v532_v50 = vld [vmem:[%s951_s6] ss:$0 sm:$0xff]  ;;  %s731_s6 = smov [#allocation2]  }
  0x24   :  { %620 = vmatprep.subr.bf16.mxu1 %v729_v1  ;;  %v541_v59 = vld [vmem:[%s953_s8] ss:$0 sm:$0xff]  ;;  %s506_s7 = sshll.u32 %s731_s6, 4  ;;  %s507_s7 = int_to_ptr.vmem [resolvable:$true] %s506_s7 }
  0x25   :  { %s705_s8 = scalar_lea.vmem %s507_s7, 128  ;;  %p710_p1 = scmp.lt.s32.totalorder %s507_s7, %s507_s7 }
  0x26   :  { %629 = vmatpush3.bf16.msra.mxu0 %v686_v19  ;;  %p706_p0 = scmp.ne.s32.totalorder %s507_s7, %s705_s8  ;;  %p711_p2 = scmp.lt.s32.totalorder %s705_s8, %s705_s8 }
  0x27   :  { %621 = vmatpush3.bf16.msra.mxu1 %v684_v17  ;;  %630 = vmatprep.subr.bf16.mxu0 %v729_v1 }
  0x28   :  { %646 = vmatprep.subr.bf16.mxu1 %v729_v1  ;;  %p712_p3 = por %p711_p2, %p710_p1 }
  0x2a   :  { %631 = vmatpush3.bf16.msra.mxu0 %v687_v20  ;;  %p713_p4 = pnand %p712_p3, %p706_p0 }
  0x2b   :  { %632 = vmatprep.subr.bf16.mxu0 %v729_v1 }
  0x2e   :  { %633 = vmatpush3.bf16.msra.mxu0 %v688_v21 }
  0x2f   :  { %634 = vmatprep.subr.bf16.mxu0 %v729_v1 }
  0x32   :  { %635 = vmatpush3.bf16.msra.mxu0 %v689_v22 }
  0x33   :  { %636 = vmatprep.subr.bf16.mxu0 %v729_v1 }
  0x36   :  { %637 = vmatpush3.bf16.msra.mxu0 %v690_v23 }
  0x37   :  { %638 = vmatprep.subr.bf16.mxu0 %v729_v1 }
  0x3a   :  { %639 = vmatpush3.bf16.msra.mxu0 %v691_v32 }
  0x3b   :  { %640 = vmatprep.subr.bf16.mxu0 %v729_v1 }
  0x3e   :  { %641 = vmatpush3.bf16.msra.mxu0 %v692_v33 }
  0xf4   :  { %v140_v25 = vpop.f32.mrb[0].mxu0 }
  0xf5   :  { %v141_v26 = vadd.f32 %v514_v24, %v140_v25  ;;  %v604_v27 = vpop.f32.mrb[1].mxu0 }
  0xf6   :  { %v143_v28 = vpop.f32.mrb[2].mxu0 }
  0xf7   :  { %v146_v29 = vmax.f32 %v141_v26, 0.0  ;;  %v605_v30 = vpop.f32.mrb[3].mxu0 }
  0xf9   :  { %v147_v31 = vpack.c.bf16 %v146_v29, %v146_v29 }
  0xfb   :  { %623 = vmatmul.mubr.bf16.vlgmr.msra.gmra.mrb[0].mxu1 %v147_v31 }
  0xfc   :  { %662 = vmatprep.mubr.msk.bf16.mxu1 %vm730_vm0, %v729_v1  ;;  %647 = vmatpush3.bf16.msra.mxu1 %v693_v34 }
  0xfd   :  { %648 = vmatprep.subr.bf16.mxu1 %v729_v1 }
 0x100   :  { %649 = vmatpush3.bf16.msra.mxu1 %v694_v35 }
 0x101   :  { %650 = vmatprep.subr.bf16.mxu1 %v729_v1 }
 0x104   :  { %651 = vmatpush3.bf16.msra.mxu1 %v695_v36 }
 0x105   :  { %652 = vmatprep.subr.bf16.mxu1 %v729_v1 }
 0x108   :  { %653 = vmatpush3.bf16.msra.mxu1 %v696_v37 }
 0x109   :  { %654 = vmatprep.subr.bf16.mxu1 %v729_v1 }
 0x10c   :  { %655 = vmatpush3.bf16.msra.mxu1 %v697_v38 }
 0x10d   :  { %656 = vmatprep.subr.bf16.mxu1 %v729_v1 }
 0x110   :  { %657 = vmatpush3.bf16.msra.mxu1 %v698_v39 }
 0x111   :  { %658 = vmatprep.subr.bf16.mxu1 %v729_v1 }
 0x114   :  { %659 = vmatpush3.bf16.msra.mxu1 %v699_v40 }
 0x115   :  { %660 = vmatprep.subr.bf16.mxu1 %v729_v1 }
 0x118   :  { %661 = vmatpush3.bf16.msra.mxu1 %v700_v49 }
 0x1ce   :  { %v253_v42 = vpop.f32.mrb[0].mxu1 }
 0x1cf   :  { %v254_v43 = vadd.f32 %v523_v41, %v253_v42  ;;  %v624_v44 = vpop.f32.mrb[1].mxu1 }
 0x1d0   :  { %v256_v45 = vpop.f32.mrb[2].mxu1 }
 0x1d1   :  { %v259_v46 = vmax.f32 %v254_v43, 0.0  ;;  %v625_v47 = vpop.f32.mrb[3].mxu1 }
 0x1d3   :  { %v260_v48 = vpack.c.bf16 %v259_v46, %v259_v46 }
 0x1d5   :  { %643 = vmatmul.mubr.bf16.vlgmr.msra.gmra.mrb[4].mxu0 %v260_v48 }
 0x2a8   :  { %v366_v51 = vpop.f32.mrb[4].mxu0 }
 0x2a9   :  { %v367_v52 = vadd.f32 %v532_v50, %v366_v51  ;;  %v644_v53 = vpop.f32.mrb[5].mxu0 }
 0x2aa   :  { %v369_v54 = vpop.f32.mrb[6].mxu0 }
 0x2ab   :  { %v372_v55 = vpack.c.bf16 %v367_v52, %v367_v52  ;;  %v645_v56 = vpop.f32.mrb[7].mxu0 }
 0x2ad   :  { %663 = vmatmul.mubr.bf16.vlgmr.msra.gmra.mrb[4].mxu1 %v372_v55 }
 0x380   :  { %v478_v60 = vpop.f32.mrb[4].mxu1 }
 0x381   :  { %v479_v61 = vadd.f32 %v541_v59, %v478_v60  ;;  %v664_v62 = vpop.f32.mrb[5].mxu1 }
 0x382   :  { %v481_v63 = vpop.f32.mrb[6].mxu1 }
 0x383   :  { %v665_v0 = vpop.f32.mrb[7].mxu1  ;;  %v487_v1 = vsel %vm486_vm1, %v479_v61, -1e+30 }
 0x384   :  { %488 = vmax.xlane.f32.xlu0 %v487_v1 }
 0x411   :  { %v489_v2 = vpop.xlane.xlu0 %488 }
 0x412   :  { %v490_v3 = vsub.f32 %v487_v1, %v489_v2 }
 0x414   :  { %v491_v4 = vmul.f32 1.442695, %v490_v3 }
 0x416   :  { %701 = vpow2.f32 %v491_v4 }
 0x420   :  { %v702_v5 = vpop.eup %701 }
 0x421   :  { %493 = vadd.xlane.f32.xlu0 %v702_v5 }
 0x4ae   :  { %v494_v6 = vpop.xlane.xlu0 %493 }
 0x4af   :  { %703 = vrcp.f32 %v494_v6 }
 0x4b9   :  { %v704_v7 = vpop.eup %703 }
 0x4ba   :  { %v496_v8 = vmul.f32 %v704_v7, %v702_v5 }
 0x4bc   :  { %v497_v9 = vmul.f32 0.71428573, %v496_v8 }
 0x4be   :  { %v498_v10 = vadd.f32 0.035714287, %v497_v9 }
 0x4c0   :  { %499 = vst [vmem:[#allocation2] sm:$0xff] %v498_v10 }
 0x4c1   :  { %716 = shalt.err (!%p713_p4)
}
 0x4c2   :  { %s717_s13 = scalar_lea.hbm %s954_s9, 128 }
 0x4c3   :  { %p718_p5 = scmp.ne.s32.totalorder %s954_s9, %s717_s13  ;;  %p721_p6 = scmp.lt.u32.totalorder %s717_s13, %s954_s9 }
 0x4c5   :  { %p723_p7 = pnand %p721_p6, %p718_p5 }
 0x4c7   :  { %726 = shalt.err (!%p723_p7)
}
 0x4c8   :  { %509 = dma.vmem_to_hbm [thread:$0]  %s507_s7, 128, %s954_s9, [#allocation3]  }
 0x4c9   :  { %727 = dma.done.wait [#allocation3], 128  }
 0x4ca   :  { %728 = vsyncadd [#allocation3], 4294967168 }
 0x4cb   :  { %513 = vsyncpa [#allocation3], 1 }

</bundles_post_ra>
